<compile_context>
chip_gen: v5e
topology: v5e:2x2
jax: 0.10.0
libtpu: 0.0.40
codegen_flags: <defaults>
</compile_context>

<pallas_src>
import jax
import jax.numpy as jnp
from jax.experimental import pallas as pl
from jax.experimental.pallas import tpu as pltpu


_INV_SQRT2 = 0.7071067811865476
_LN_EPS = 1e-5  # torch.nn.LayerNorm default


def _layernorm(v, gamma, beta):
    mu = jnp.mean(v, axis=-1, keepdims=True)
    var = jnp.mean(jnp.square(v - mu), axis=-1, keepdims=True)
    return (v - mu) * jax.lax.rsqrt(var + _LN_EPS) * gamma + beta


def _gelu_exact(v):
    # torch.nn.GELU() default (erf based, not tanh approximation).
    # TODO(synk): erf expands to a long VALU polynomial; switch to the
    # tanh/EUP approximation only if the numerics budget allows.
    return 0.5 * v * (1.0 + jax.lax.erf(v * _INV_SQRT2))


def path_kernel(x_ref, m_ref,
                g1_ref, be1_ref, a1_ref, b1_ref, a2_ref, b2_ref,
                g2_ref, be2_ref, w3t_ref, b3_ref, w4t_ref, b4_ref,
                g3_ref, be3_ref,
                o_ref):
    bf16 = jnp.bfloat16
    x = x_ref[...]          # (R, D) f32, R = TB*C rows (batch-major, channel-minor)
    m = m_ref[...]          # (R, D) f32

    # ---- chan_update: LN(dim) -> Conv1d(C->Ci, k=1) -> GELU -> Conv1d(Ci->C) ----
    # Channel mixing as a single block-diagonal MXU matmul: a1 = kron(I_TB, W1).
    h = _layernorm(x * m, g1_ref[...], be1_ref[...])                     # (R, D) f32
    y = jnp.dot(a1_ref[...], h.astype(bf16),
                preferred_element_type=jnp.float32) + b1_ref[...]        # (TB*Ci, D)
    y = _gelu_exact(y)
    d = jnp.dot(a2_ref[...], y.astype(bf16),
                preferred_element_type=jnp.float32) + b2_ref[...]        # (R, D)
    x = x + d

    # ---- inner_update: LN(dim) -> Linear(D->Di) -> GELU -> Linear(Di->D) ----
    h2 = _layernorm(x * m, g2_ref[...], be2_ref[...])                    # (R, D)
    z = jnp.dot(h2.astype(bf16), w3t_ref[...],
                preferred_element_type=jnp.float32) + b3_ref[...]        # (R, Di)
    z = _gelu_exact(z)
    z = jnp.dot(z.astype(bf16), w4t_ref[...],
                preferred_element_type=jnp.float32) + b4_ref[...]        # (R, D)
    x = x + z

    # ---- final norm ----
    o_ref[...] = _layernorm(x, g3_ref[...], be3_ref[...])


def _pick_tb(B, C, D, target_rows=512, vmem_budget=16 * 1024 * 1024):
    """Largest batch-tile TB that divides B, keeps rows sublane-aligned and
    fits comfortably in VMEM (sized for v7x's 64 MiB with big headroom)."""
    best = 1
    for tb in range(1, B + 1):
        if B % tb:
            continue
        rows = tb * C
        if tb != B and rows % 8:          # (8,128) rule unless block == full array
            continue
        if rows > target_rows:
            continue
        if 3 * 2 * rows * D * 4 > vmem_budget:   # x/mask/out, double-buffered, f32
            continue
        best = max(best, tb)
    # Keep >= 2 grid steps when possible so both v7x TensorCores get work.
    if best == B and B > 1:
        for tb in range(B // 2, 0, -1):
            if B % tb == 0 and (tb * C) % 8 == 0 and tb * C <= target_rows:
                best = tb
                break
    return best


def path_model_pallas(x, mask, params, tb=None):
    B, C, D = x.shape
    Ci = params["conv1_w"].shape[0]
    Di = params["lin1_wT"].shape[1]
    if tb is None:
        tb = _pick_tb(B, C, D)
    assert B % tb == 0
    R = tb * C
    bf16 = jnp.bfloat16

    # Block-diagonal (kron) conv weights + row-tiled conv biases.
    eye = jnp.eye(tb, dtype=jnp.float32)
    a1 = jnp.kron(eye, params["conv1_w"]).astype(bf16)             # (tb*Ci, tb*C)
    a2 = jnp.kron(eye, params["conv2_w"]).astype(bf16)             # (tb*C, tb*Ci)
    b1r = jnp.tile(params["conv1_b"].reshape(-1), tb).reshape(tb * Ci, 1)
    b2r = jnp.tile(params["conv2_b"].reshape(-1), tb).reshape(tb * C, 1)

    weights = [
        params["ln1_g"], params["ln1_b"], a1, b1r, a2, b2r,
        params["ln2_g"], params["ln2_b"],
        params["lin1_wT"].astype(bf16), params["lin1_b"],
        params["lin2_wT"].astype(bf16), params["lin2_b"],
        params["ln3_g"], params["ln3_b"],
    ]

    # Free HBM reshape: rows are (batch-major, channel-minor).
    x2 = x.reshape(B * C, D)
    m2 = mask.reshape(B * C, D)

    def bcast_spec(w):
        # Grid-invariant block (constant index_map) -> fetched once, not per step.
        return pl.BlockSpec(w.shape, lambda b: (0, 0))

    in_specs = (
        [pl.BlockSpec((R, D), lambda b: (b, 0)),      # x rows
         pl.BlockSpec((R, D), lambda b: (b, 0))]      # mask rows
        + [bcast_spec(w) for w in weights]
    )

    grid_spec = pltpu.PrefetchScalarGridSpec(
        num_scalar_prefetch=0,
        grid=(B // tb,),
        in_specs=in_specs,
        out_specs=pl.BlockSpec((R, D), lambda b: (b, 0)),
    )

    flops = int(4 * B * C * D * (Ci + Di))                     # useful matmul flops
    transcendentals = int(B * (Ci * D + C * Di) + 3 * B * C)   # erf + rsqrt
    bytes_accessed = int(3 * B * C * D * 4
                         + sum(int(w.size) * w.dtype.itemsize for w in weights))

    out = pl.pallas_call(
        path_kernel,
        out_shape=jax.ShapeDtypeStruct((B * C, D), jnp.float32),
        grid_spec=grid_spec,
        compiler_params=pltpu.CompilerParams(
            dimension_semantics=("parallel",),
            vmem_limit_bytes=32 * 1024 * 1024),
        cost_estimate=pl.CostEstimate(
            flops=flops,
            transcendentals=transcendentals,
            bytes_accessed=bytes_accessed),
    )(x2, m2, *weights)
    return out.reshape(B, C, D)


# ------------------------- pure-JAX reference -------------------------
def path_model_ref(x, mask, params, matmul_dtype=jnp.bfloat16):
    dt = matmul_dtype
    w1 = params["conv1_w"].astype(dt)
    w2 = params["conv2_w"].astype(dt)
    w3t = params["lin1_wT"].astype(dt)
    w4t = params["lin2_wT"].astype(dt)

    h = _layernorm(x * mask, params["ln1_g"], params["ln1_b"])
    y = jnp.einsum("oc,bcd->bod", w1, h.astype(dt),
                   preferred_element_type=jnp.float32)
    y = y + params["conv1_b"].reshape(1, -1, 1)
    y = _gelu_exact(y)
    y = jnp.einsum("oc,bcd->bod", w2, y.astype(dt),
                   preferred_element_type=jnp.float32)
    y = y + params["conv2_b"].reshape(1, -1, 1)
    x = y + x

    h2 = _layernorm(x * mask, params["ln2_g"], params["ln2_b"])
    z = jnp.einsum("bcd,de->bce", h2.astype(dt), w3t,
                   preferred_element_type=jnp.float32) + params["lin1_b"]
    z = _gelu_exact(z)
    z = jnp.einsum("bce,ed->bcd", z.astype(dt), w4t,
                   preferred_element_type=jnp.float32) + params["lin2_b"]
    x = z + x

    return _layernorm(x, params["ln3_g"], params["ln3_b"])


def make_params(key, channel, dim, exp_rate=0.5):
    inner_channel = int(channel * exp_rate)
    inner_dim = int(dim * exp_rate)
    ks = jax.random.split(key, 14)
    f32 = jnp.float32
    return {
        # LayerNorm params stored as (1, D) for 2-D-friendly VMEM layout.
        "ln1_g": 1.0 + 0.1 * jax.random.normal(ks[8], (1, dim), f32),
        "ln1_b": 0.1 * jax.random.normal(ks[9], (1, dim), f32),
        "ln2_g": 1.0 + 0.1 * jax.random.normal(ks[10], (1, dim), f32),
        "ln2_b": 0.1 * jax.random.normal(ks[11], (1, dim), f32),
        "ln3_g": 1.0 + 0.1 * jax.random.normal(ks[12], (1, dim), f32),
        "ln3_b": 0.1 * jax.random.normal(ks[13], (1, dim), f32),
        # Conv1d(k=1) weights: torch shape (out, in, 1) -> (out, in); bias (out, 1).
        "conv1_w": jax.random.normal(ks[0], (inner_channel, channel), f32) * 0.1,
        "conv1_b": jax.random.normal(ks[1], (inner_channel, 1), f32) * 0.1,
        "conv2_w": jax.random.normal(ks[2], (channel, inner_channel), f32) * 0.1,
        "conv2_b": jax.random.normal(ks[3], (channel, 1), f32) * 0.1,
        # Linear weights: torch shape (out, in) -> stored pre-transposed (in, out).
        "lin1_wT": jax.random.normal(ks[4], (dim, inner_dim), f32) * 0.1,
        "lin1_b": jax.random.normal(ks[5], (1, inner_dim), f32) * 0.1,
        "lin2_wT": jax.random.normal(ks[6], (inner_dim, dim), f32) * 0.1,
        "lin2_b": jax.random.normal(ks[7], (1, dim), f32) * 0.1,
    }


if __name__ == "__main__":
    B, C, D = 8, 4, 32  # batch, channel, dim  (inner_channel=2, inner_dim=16)
    key = jax.random.PRNGKey(0)
    kx, km, kp = jax.random.split(key, 3)

    x = jax.random.normal(kx, (B, C, D), jnp.float32)
    mask = (jax.random.uniform(km, (B, C, D)) > 0.2).astype(jnp.float32)
    params = make_params(kp, C, D, exp_rate=0.5)

    out = jax.block_until_ready(path_model_pallas(x, mask, params))
    assert out.shape == (B, C, D)

    # Reference with the same dtype policy (bf16 matmul operands, f32 accum).
    ref_bf16 = path_model_ref(x, mask, params, matmul_dtype=jnp.bfloat16)
    assert jnp.allclose(out, ref_bf16, rtol=1e-3, atol=1e-3), "mismatch vs bf16 ref"

    # Loose check vs the full-f32 (torch-exact) math: bounds the bf16 deviation.
    ref_f32 = path_model_ref(x, mask, params, matmul_dtype=jnp.float32)
    assert jnp.allclose(out, ref_f32, rtol=5e-2, atol=5e-2), "mismatch vs f32 ref"

    print("KERNEL_OK")
</pallas_src>

<mosaic_0001>
module attributes {stable_mosaic.version = 11 : i64} {
  func.func @path_kernel(%arg0: i32, %arg1: memref<16x32xf32, #tpu.memory_space<vmem>>, %arg2: memref<16x32xf32, #tpu.memory_space<vmem>>, %arg3: memref<1x32xf32, #tpu.memory_space<vmem>>, %arg4: memref<1x32xf32, #tpu.memory_space<vmem>>, %arg5: memref<8x16xbf16, #tpu.memory_space<vmem>>, %arg6: memref<8x1xf32, #tpu.memory_space<vmem>>, %arg7: memref<16x8xbf16, #tpu.memory_space<vmem>>, %arg8: memref<16x1xf32, #tpu.memory_space<vmem>>, %arg9: memref<1x32xf32, #tpu.memory_space<vmem>>, %arg10: memref<1x32xf32, #tpu.memory_space<vmem>>, %arg11: memref<32x16xbf16, #tpu.memory_space<vmem>>, %arg12: memref<1x16xf32, #tpu.memory_space<vmem>>, %arg13: memref<16x32xbf16, #tpu.memory_space<vmem>>, %arg14: memref<1x32xf32, #tpu.memory_space<vmem>>, %arg15: memref<1x32xf32, #tpu.memory_space<vmem>>, %arg16: memref<1x32xf32, #tpu.memory_space<vmem>>, %arg17: memref<16x32xf32, #tpu.memory_space<vmem>>) attributes {dimension_semantics = [#tpu.dimension_semantics<parallel>], iteration_bounds = array<i64: 2>, scalar_prefetch = 0 : i64, scratch_operands = 0 : i64, tpu.core_type = #tpu.core_type<tc>, window_params = [{transform_indices = @transform_0, window_bounds = array<i64: 16, 32>}, {transform_indices = @transform_1, window_bounds = array<i64: 16, 32>}, {pipeline_mode = #tpu.pipeline_mode<synchronous>, transform_indices = @transform_2, window_bounds = array<i64: 1, 32>}, {pipeline_mode = #tpu.pipeline_mode<synchronous>, transform_indices = @transform_3, window_bounds = array<i64: 1, 32>}, {pipeline_mode = #tpu.pipeline_mode<synchronous>, transform_indices = @transform_4, window_bounds = array<i64: 8, 16>}, {pipeline_mode = #tpu.pipeline_mode<synchronous>, transform_indices = @transform_5, window_bounds = array<i64: 8, 1>}, {pipeline_mode = #tpu.pipeline_mode<synchronous>, transform_indices = @transform_6, window_bounds = array<i64: 16, 8>}, {pipeline_mode = #tpu.pipeline_mode<synchronous>, transform_indices = @transform_7, window_bounds = array<i64: 16, 1>}, {pipeline_mode = #tpu.pipeline_mode<synchronous>, transform_indices = @transform_8, window_bounds = array<i64: 1, 32>}, {pipeline_mode = #tpu.pipeline_mode<synchronous>, transform_indices = @transform_9, window_bounds = array<i64: 1, 32>}, {pipeline_mode = #tpu.pipeline_mode<synchronous>, transform_indices = @transform_10, window_bounds = array<i64: 32, 16>}, {pipeline_mode = #tpu.pipeline_mode<synchronous>, transform_indices = @transform_11, window_bounds = array<i64: 1, 16>}, {pipeline_mode = #tpu.pipeline_mode<synchronous>, transform_indices = @transform_12, window_bounds = array<i64: 16, 32>}, {pipeline_mode = #tpu.pipeline_mode<synchronous>, transform_indices = @transform_13, window_bounds = array<i64: 1, 32>}, {pipeline_mode = #tpu.pipeline_mode<synchronous>, transform_indices = @transform_14, window_bounds = array<i64: 1, 32>}, {pipeline_mode = #tpu.pipeline_mode<synchronous>, transform_indices = @transform_15, window_bounds = array<i64: 1, 32>}, {transform_indices = @transform_16, window_bounds = array<i64: 16, 32>}]} {
    %c0 = arith.constant 0 : index
    %c0_0 = arith.constant 0 : index
    %0 = vector.load %arg1[%c0, %c0_0] : memref<16x32xf32, #tpu.memory_space<vmem>>, vector<16x32xf32>
    %c0_1 = arith.constant 0 : index
    %c0_2 = arith.constant 0 : index
    %1 = vector.load %arg2[%c0_1, %c0_2] : memref<16x32xf32, #tpu.memory_space<vmem>>, vector<16x32xf32>
    %2 = arith.mulf %0, %1 : vector<16x32xf32>
    %c0_3 = arith.constant 0 : index
    %c0_4 = arith.constant 0 : index
    %3 = vector.load %arg3[%c0_3, %c0_4] : memref<1x32xf32, #tpu.memory_space<vmem>>, vector<1x32xf32>
    %c0_5 = arith.constant 0 : index
    %c0_6 = arith.constant 0 : index
    %4 = vector.load %arg4[%c0_5, %c0_6] : memref<1x32xf32, #tpu.memory_space<vmem>>, vector<1x32xf32>
    %cst = arith.constant dense<0.000000e+00> : vector<16xf32>
    %5 = vector.multi_reduction <add>, %2, %cst [1] : vector<16x32xf32> to vector<16xf32>
    %6 = vector.shape_cast %5 : vector<16xf32> to vector<16x1xf32>
    %cst_7 = arith.constant 3.200000e+01 : f32
    %7 = vector.broadcast %cst_7 : f32 to vector<16x1xf32>
    %8 = arith.divf %6, %7 : vector<16x1xf32>
    %9 = vector.broadcast %8 : vector<16x1xf32> to vector<16x32xf32>
    %10 = arith.subf %2, %9 : vector<16x32xf32>
    %11 = arith.mulf %10, %10 : vector<16x32xf32>
    %cst_8 = arith.constant dense<0.000000e+00> : vector<16xf32>
    %12 = vector.multi_reduction <add>, %11, %cst_8 [1] : vector<16x32xf32> to vector<16xf32>
    %13 = vector.shape_cast %12 : vector<16xf32> to vector<16x1xf32>
    %cst_9 = arith.constant 3.200000e+01 : f32
    %14 = vector.broadcast %cst_9 : f32 to vector<16x1xf32>
    %15 = arith.divf %13, %14 : vector<16x1xf32>
    %16 = vector.broadcast %8 : vector<16x1xf32> to vector<16x32xf32>
    %17 = arith.subf %2, %16 : vector<16x32xf32>
    %cst_10 = arith.constant 9.99999974E-6 : f32
    %18 = vector.broadcast %cst_10 : f32 to vector<16x1xf32>
    %19 = arith.addf %15, %18 : vector<16x1xf32>
    %20 = math.rsqrt %19 : vector<16x1xf32>
    %21 = vector.broadcast %20 : vector<16x1xf32> to vector<16x32xf32>
    %22 = arith.mulf %17, %21 : vector<16x32xf32>
    %23 = vector.broadcast %3 : vector<1x32xf32> to vector<16x32xf32>
    %24 = arith.mulf %22, %23 : vector<16x32xf32>
    %25 = vector.broadcast %4 : vector<1x32xf32> to vector<16x32xf32>
    %26 = arith.addf %24, %25 : vector<16x32xf32>
    %c0_11 = arith.constant 0 : index
    %c0_12 = arith.constant 0 : index
    %27 = vector.load %arg5[%c0_11, %c0_12] : memref<8x16xbf16, #tpu.memory_space<vmem>>, vector<8x16xbf16>
    %28 = arith.truncf %26 : vector<16x32xf32> to vector<16x32xbf16>
    %cst_13 = arith.constant dense<0.000000e+00> : vector<8x32xf32>
    %29 = tpu.matmul %27, %28, %cst_13 {dimension_numbers = #tpu.dot_dimension_numbers<[1], [0], [0], [1], [0, 0, 1, 1], [], []>} : vector<8x16xbf16>, vector<16x32xbf16>, vector<8x32xf32> -> vector<8x32xf32>
    %c0_14 = arith.constant 0 : index
    %c0_15 = arith.constant 0 : index
    %30 = vector.load %arg6[%c0_14, %c0_15] : memref<8x1xf32, #tpu.memory_space<vmem>>, vector<8x1xf32>
    %31 = vector.broadcast %30 : vector<8x1xf32> to vector<8x32xf32>
    %32 = arith.addf %29, %31 : vector<8x32xf32>
    %cst_16 = arith.constant 5.000000e-01 : f32
    %33 = vector.broadcast %cst_16 : f32 to vector<8x32xf32>
    %34 = arith.mulf %33, %32 : vector<8x32xf32>
    %cst_17 = arith.constant 0.707106769 : f32
    %35 = vector.broadcast %cst_17 : f32 to vector<8x32xf32>
    %36 = arith.mulf %32, %35 : vector<8x32xf32>
    %37 = math.erf %36 : vector<8x32xf32>
    %cst_18 = arith.constant 1.000000e+00 : f32
    %38 = vector.broadcast %cst_18 : f32 to vector<8x32xf32>
    %39 = arith.addf %38, %37 : vector<8x32xf32>
    %40 = arith.mulf %34, %39 : vector<8x32xf32>
    %c0_19 = arith.constant 0 : index
    %c0_20 = arith.constant 0 : index
    %41 = vector.load %arg7[%c0_19, %c0_20] : memref<16x8xbf16, #tpu.memory_space<vmem>>, vector<16x8xbf16>
    %42 = arith.truncf %40 : vector<8x32xf32> to vector<8x32xbf16>
    %cst_21 = arith.constant dense<0.000000e+00> : vector<16x32xf32>
    %43 = tpu.matmul %41, %42, %cst_21 {dimension_numbers = #tpu.dot_dimension_numbers<[1], [0], [0], [1], [0, 0, 1, 1], [], []>} : vector<16x8xbf16>, vector<8x32xbf16>, vector<16x32xf32> -> vector<16x32xf32>
    %c0_22 = arith.constant 0 : index
    %c0_23 = arith.constant 0 : index
    %44 = vector.load %arg8[%c0_22, %c0_23] : memref<16x1xf32, #tpu.memory_space<vmem>>, vector<16x1xf32>
    %45 = vector.broadcast %44 : vector<16x1xf32> to vector<16x32xf32>
    %46 = arith.addf %43, %45 : vector<16x32xf32>
    %47 = arith.addf %0, %46 : vector<16x32xf32>
    %48 = arith.mulf %47, %1 : vector<16x32xf32>
    %c0_24 = arith.constant 0 : index
    %c0_25 = arith.constant 0 : index
    %49 = vector.load %arg9[%c0_24, %c0_25] : memref<1x32xf32, #tpu.memory_space<vmem>>, vector<1x32xf32>
    %c0_26 = arith.constant 0 : index
    %c0_27 = arith.constant 0 : index
    %50 = vector.load %arg10[%c0_26, %c0_27] : memref<1x32xf32, #tpu.memory_space<vmem>>, vector<1x32xf32>
    %cst_28 = arith.constant dense<0.000000e+00> : vector<16xf32>
    %51 = vector.multi_reduction <add>, %48, %cst_28 [1] : vector<16x32xf32> to vector<16xf32>
    %52 = vector.shape_cast %51 : vector<16xf32> to vector<16x1xf32>
    %cst_29 = arith.constant 3.200000e+01 : f32
    %53 = vector.broadcast %cst_29 : f32 to vector<16x1xf32>
    %54 = arith.divf %52, %53 : vector<16x1xf32>
    %55 = vector.broadcast %54 : vector<16x1xf32> to vector<16x32xf32>
    %56 = arith.subf %48, %55 : vector<16x32xf32>
    %57 = arith.mulf %56, %56 : vector<16x32xf32>
    %cst_30 = arith.constant dense<0.000000e+00> : vector<16xf32>
    %58 = vector.multi_reduction <add>, %57, %cst_30 [1] : vector<16x32xf32> to vector<16xf32>
    %59 = vector.shape_cast %58 : vector<16xf32> to vector<16x1xf32>
    %cst_31 = arith.constant 3.200000e+01 : f32
    %60 = vector.broadcast %cst_31 : f32 to vector<16x1xf32>
    %61 = arith.divf %59, %60 : vector<16x1xf32>
    %62 = vector.broadcast %54 : vector<16x1xf32> to vector<16x32xf32>
    %63 = arith.subf %48, %62 : vector<16x32xf32>
    %cst_32 = arith.constant 9.99999974E-6 : f32
    %64 = vector.broadcast %cst_32 : f32 to vector<16x1xf32>
    %65 = arith.addf %61, %64 : vector<16x1xf32>
    %66 = math.rsqrt %65 : vector<16x1xf32>
    %67 = vector.broadcast %66 : vector<16x1xf32> to vector<16x32xf32>
    %68 = arith.mulf %63, %67 : vector<16x32xf32>
    %69 = vector.broadcast %49 : vector<1x32xf32> to vector<16x32xf32>
    %70 = arith.mulf %68, %69 : vector<16x32xf32>
    %71 = vector.broadcast %50 : vector<1x32xf32> to vector<16x32xf32>
    %72 = arith.addf %70, %71 : vector<16x32xf32>
    %73 = arith.truncf %72 : vector<16x32xf32> to vector<16x32xbf16>
    %c0_33 = arith.constant 0 : index
    %c0_34 = arith.constant 0 : index
    %74 = vector.load %arg11[%c0_33, %c0_34] : memref<32x16xbf16, #tpu.memory_space<vmem>>, vector<32x16xbf16>
    %cst_35 = arith.constant dense<0.000000e+00> : vector<16x16xf32>
    %75 = tpu.matmul %73, %74, %cst_35 {dimension_numbers = #tpu.dot_dimension_numbers<[1], [0], [0], [1], [0, 0, 1, 1], [], []>} : vector<16x32xbf16>, vector<32x16xbf16>, vector<16x16xf32> -> vector<16x16xf32>
    %c0_36 = arith.constant 0 : index
    %c0_37 = arith.constant 0 : index
    %76 = vector.load %arg12[%c0_36, %c0_37] : memref<1x16xf32, #tpu.memory_space<vmem>>, vector<1x16xf32>
    %77 = vector.broadcast %76 : vector<1x16xf32> to vector<16x16xf32>
    %78 = arith.addf %75, %77 : vector<16x16xf32>
    %cst_38 = arith.constant 5.000000e-01 : f32
    %79 = vector.broadcast %cst_38 : f32 to vector<16x16xf32>
    %80 = arith.mulf %79, %78 : vector<16x16xf32>
    %cst_39 = arith.constant 0.707106769 : f32
    %81 = vector.broadcast %cst_39 : f32 to vector<16x16xf32>
    %82 = arith.mulf %78, %81 : vector<16x16xf32>
    %83 = math.erf %82 : vector<16x16xf32>
    %cst_40 = arith.constant 1.000000e+00 : f32
    %84 = vector.broadcast %cst_40 : f32 to vector<16x16xf32>
    %85 = arith.addf %84, %83 : vector<16x16xf32>
    %86 = arith.mulf %80, %85 : vector<16x16xf32>
    %87 = arith.truncf %86 : vector<16x16xf32> to vector<16x16xbf16>
    %c0_41 = arith.constant 0 : index
    %c0_42 = arith.constant 0 : index
    %88 = vector.load %arg13[%c0_41, %c0_42] : memref<16x32xbf16, #tpu.memory_space<vmem>>, vector<16x32xbf16>
    %cst_43 = arith.constant dense<0.000000e+00> : vector<16x32xf32>
    %89 = tpu.matmul %87, %88, %cst_43 {dimension_numbers = #tpu.dot_dimension_numbers<[1], [0], [0], [1], [0, 0, 1, 1], [], []>} : vector<16x16xbf16>, vector<16x32xbf16>, vector<16x32xf32> -> vector<16x32xf32>
    %c0_44 = arith.constant 0 : index
    %c0_45 = arith.constant 0 : index
    %90 = vector.load %arg14[%c0_44, %c0_45] : memref<1x32xf32, #tpu.memory_space<vmem>>, vector<1x32xf32>
    %91 = vector.broadcast %90 : vector<1x32xf32> to vector<16x32xf32>
    %92 = arith.addf %89, %91 : vector<16x32xf32>
    %93 = arith.addf %47, %92 : vector<16x32xf32>
    %c0_46 = arith.constant 0 : index
    %c0_47 = arith.constant 0 : index
    %94 = vector.load %arg15[%c0_46, %c0_47] : memref<1x32xf32, #tpu.memory_space<vmem>>, vector<1x32xf32>
    %c0_48 = arith.constant 0 : index
    %c0_49 = arith.constant 0 : index
    %95 = vector.load %arg16[%c0_48, %c0_49] : memref<1x32xf32, #tpu.memory_space<vmem>>, vector<1x32xf32>
    %cst_50 = arith.constant dense<0.000000e+00> : vector<16xf32>
    %96 = vector.multi_reduction <add>, %93, %cst_50 [1] : vector<16x32xf32> to vector<16xf32>
    %97 = vector.shape_cast %96 : vector<16xf32> to vector<16x1xf32>
    %cst_51 = arith.constant 3.200000e+01 : f32
    %98 = vector.broadcast %cst_51 : f32 to vector<16x1xf32>
    %99 = arith.divf %97, %98 : vector<16x1xf32>
    %100 = vector.broadcast %99 : vector<16x1xf32> to vector<16x32xf32>
    %101 = arith.subf %93, %100 : vector<16x32xf32>
    %102 = arith.mulf %101, %101 : vector<16x32xf32>
    %cst_52 = arith.constant dense<0.000000e+00> : vector<16xf32>
    %103 = vector.multi_reduction <add>, %102, %cst_52 [1] : vector<16x32xf32> to vector<16xf32>
    %104 = vector.shape_cast %103 : vector<16xf32> to vector<16x1xf32>
    %cst_53 = arith.constant 3.200000e+01 : f32
    %105 = vector.broadcast %cst_53 : f32 to vector<16x1xf32>
    %106 = arith.divf %104, %105 : vector<16x1xf32>
    %107 = vector.broadcast %99 : vector<16x1xf32> to vector<16x32xf32>
    %108 = arith.subf %93, %107 : vector<16x32xf32>
    %cst_54 = arith.constant 9.99999974E-6 : f32
    %109 = vector.broadcast %cst_54 : f32 to vector<16x1xf32>
    %110 = arith.addf %106, %109 : vector<16x1xf32>
    %111 = math.rsqrt %110 : vector<16x1xf32>
    %112 = vector.broadcast %111 : vector<16x1xf32> to vector<16x32xf32>
    %113 = arith.mulf %108, %112 : vector<16x32xf32>
    %114 = vector.broadcast %94 : vector<1x32xf32> to vector<16x32xf32>
    %115 = arith.mulf %113, %114 : vector<16x32xf32>
    %116 = vector.broadcast %95 : vector<1x32xf32> to vector<16x32xf32>
    %117 = arith.addf %115, %116 : vector<16x32xf32>
    %c0_55 = arith.constant 0 : index
    %c0_56 = arith.constant 0 : index
    %118 = vector.load %arg17[%c0_55, %c0_56] : memref<16x32xf32, #tpu.memory_space<vmem>>, vector<16x32xf32>
    tpu.vector_store %arg17[%c0_55, %c0_56], %117 {strides = array<i32>} : memref<16x32xf32, #tpu.memory_space<vmem>>, vector<16x32xf32>,
    return
  }
  func.func @transform_0(%arg0: i32) -> (i32, i32) {
    %c0_i32 = arith.constant 0 : i32
    %c0_i32_0 = arith.constant 0 : i32
    return %arg0, %c0_i32 : i32, i32
  }
  func.func @transform_1(%arg0: i32) -> (i32, i32) {
    %c0_i32 = arith.constant 0 : i32
    %c0_i32_0 = arith.constant 0 : i32
    return %arg0, %c0_i32 : i32, i32
  }
  func.func @transform_2(%arg0: i32) -> (i32, i32) {
    %c0_i32 = arith.constant 0 : i32
    %c0_i32_0 = arith.constant 0 : i32
    %c0_i32_1 = arith.constant 0 : i32
    return %c0_i32, %c0_i32_0 : i32, i32
  }
  func.func @transform_3(%arg0: i32) -> (i32, i32) {
    %c0_i32 = arith.constant 0 : i32
    %c0_i32_0 = arith.constant 0 : i32
    %c0_i32_1 = arith.constant 0 : i32
    return %c0_i32, %c0_i32_0 : i32, i32
  }
  func.func @transform_4(%arg0: i32) -> (i32, i32) {
    %c0_i32 = arith.constant 0 : i32
    %c0_i32_0 = arith.constant 0 : i32
    %c0_i32_1 = arith.constant 0 : i32
    return %c0_i32, %c0_i32_0 : i32, i32
  }
  func.func @transform_5(%arg0: i32) -> (i32, i32) {
    %c0_i32 = arith.constant 0 : i32
    %c0_i32_0 = arith.constant 0 : i32
    %c0_i32_1 = arith.constant 0 : i32
    return %c0_i32, %c0_i32_0 : i32, i32
  }
  func.func @transform_6(%arg0: i32) -> (i32, i32) {
    %c0_i32 = arith.constant 0 : i32
    %c0_i32_0 = arith.constant 0 : i32
    %c0_i32_1 = arith.constant 0 : i32
    return %c0_i32, %c0_i32_0 : i32, i32
  }
  func.func @transform_7(%arg0: i32) -> (i32, i32) {
    %c0_i32 = arith.constant 0 : i32
    %c0_i32_0 = arith.constant 0 : i32
    %c0_i32_1 = arith.constant 0 : i32
    return %c0_i32, %c0_i32_0 : i32, i32
  }
  func.func @transform_8(%arg0: i32) -> (i32, i32) {
    %c0_i32 = arith.constant 0 : i32
    %c0_i32_0 = arith.constant 0 : i32
    %c0_i32_1 = arith.constant 0 : i32
    return %c0_i32, %c0_i32_0 : i32, i32
  }
  func.func @transform_9(%arg0: i32) -> (i32, i32) {
    %c0_i32 = arith.constant 0 : i32
    %c0_i32_0 = arith.constant 0 : i32
    %c0_i32_1 = arith.constant 0 : i32
    return %c0_i32, %c0_i32_0 : i32, i32
  }
  func.func @transform_10(%arg0: i32) -> (i32, i32) {
    %c0_i32 = arith.constant 0 : i32
    %c0_i32_0 = arith.constant 0 : i32
    %c0_i32_1 = arith.constant 0 : i32
    return %c0_i32, %c0_i32_0 : i32, i32
  }
  func.func @transform_11(%arg0: i32) -> (i32, i32) {
    %c0_i32 = arith.constant 0 : i32
    %c0_i32_0 = arith.constant 0 : i32
    %c0_i32_1 = arith.constant 0 : i32
    return %c0_i32, %c0_i32_0 : i32, i32
  }
  func.func @transform_12(%arg0: i32) -> (i32, i32) {
    %c0_i32 = arith.constant 0 : i32
    %c0_i32_0 = arith.constant 0 : i32
    %c0_i32_1 = arith.constant 0 : i32
    return %c0_i32, %c0_i32_0 : i32, i32
  }
  func.func @transform_13(%arg0: i32) -> (i32, i32) {
    %c0_i32 = arith.constant 0 : i32
    %c0_i32_0 = arith.constant 0 : i32
    %c0_i32_1 = arith.constant 0 : i32
    return %c0_i32, %c0_i32_0 : i32, i32
  }
  func.func @transform_14(%arg0: i32) -> (i32, i32) {
    %c0_i32 = arith.constant 0 : i32
    %c0_i32_0 = arith.constant 0 : i32
    %c0_i32_1 = arith.constant 0 : i32
    return %c0_i32, %c0_i32_0 : i32, i32
  }
  func.func @transform_15(%arg0: i32) -> (i32, i32) {
    %c0_i32 = arith.constant 0 : i32
    %c0_i32_0 = arith.constant 0 : i32
    %c0_i32_1 = arith.constant 0 : i32
    return %c0_i32, %c0_i32_0 : i32, i32
  }
  func.func @transform_16(%arg0: i32) -> (i32, i32) {
    %c0_i32 = arith.constant 0 : i32
    %c0_i32_0 = arith.constant 0 : i32
    return %arg0, %c0_i32 : i32, i32
  }
}

</mosaic_0001>

<bundles_post_ra>
// kernel: tpu_custom_call.1
= control target key start
LH: loop header
LB: loop body
LE: loop exit
PB: predicated region body
PF: predicated region fallthrough
CT: control target
= control target key end

     0   :  { %s1697_s0 = inlined_call_operand.vmem [shape: f32[32,32], index: 0, kind: input, shape index: {}]   ;;  %s1698_s1 = inlined_call_operand.hbm [shape: f32[32,32], index: 1, kind: input, shape index: {}]   ;;  %s1699_s2 = inlined_call_operand.vmem [shape: f32[1,32], index: 2, kind: input, shape index: {}]   ;;  %s1700_s3 = inlined_call_operand.vmem [shape: f32[1,32], index: 3, kind: input, shape index: {}]   ;;  %s1701_s4 = inlined_call_operand.vmem [shape: bf16[8,16], index: 4, kind: input, shape index: {}]   ;;  %s1702_s5 = inlined_call_operand.vmem [shape: f32[8,1], index: 5, kind: input, shape index: {}]   ;;  %s1703_s6 = inlined_call_operand.vmem [shape: bf16[16,8], index: 6, kind: input, shape index: {}]   ;;  %s1704_s7 = inlined_call_operand.vmem [shape: f32[16,1], index: 7, kind: input, shape index: {}]   ;;  %s1705_s8 = inlined_call_operand.vmem [shape: f32[1,32], index: 8, kind: input, shape index: {}]   ;;  %s1706_s9 = inlined_call_operand.vmem [shape: f32[1,32], index: 9, kind: input, shape index: {}]   ;;  %s1707_s10 = inlined_call_operand.vmem [shape: bf16[32,16], index: 10, kind: input, shape index: {}]   ;;  %s1708_s11 = inlined_call_operand.vmem [shape: f32[1,16], index: 11, kind: input, shape index: {}]   ;;  %s1709_s12 = inlined_call_operand.vmem [shape: bf16[16,32], index: 12, kind: input, shape index: {}]   ;;  %s1710_s13 = inlined_call_operand.vmem [shape: f32[1,32], index: 13, kind: input, shape index: {}]   ;;  %s1711_s14 = inlined_call_operand.vmem [shape: f32[1,32], index: 14, kind: input, shape index: {}]   ;;  %s1712_s15 = inlined_call_operand.vmem [shape: f32[1,32], index: 15, kind: input, shape index: {}]   ;;  %s1713_s16 = inlined_call_operand.hbm [shape: f32[32,32], index: 16, kind: output, shape index: {}]  }
   0x1   :  { %1722 = sst [smem:[#allocation14_spill]] %s1697_s0 }
   0x2   :  { %1723 = sst [smem:[#allocation15_spill]] %s1698_s1 }
   0x3   :  { %1724 = sst [smem:[#allocation16_spill]] %s1711_s14 }
   0x4   :  { %1725 = sst [smem:[#allocation17_spill]] %s1712_s15 }
   0x5   :  { %1726 = sst [smem:[#allocation18_spill]] %s1713_s16 }
   0x6   :  { %21 = vsyncpa [#allocation3], 0 }
   0x7   :  { %23 = vsyncpa [#allocation3 + $0x1], 0 }
   0x8   :  { %24 = vsyncpa [#allocation4], 0 }
   0x9   :  { %26 = vsyncpa [#allocation4 + $0x1], 0  ;;  %s1441_s21 = smov 0   ;;  %s1443_s22 = smov 0  }
   0xa   :  { %s1445_s23 = smov 0   ;;  %s1447_s24 = smov 0  }
   0xb LB: > { %1727 = sst [smem:[#allocation8_spill]] %s1336_s21  ;;  %s1462_s25 = sadd.s32 4294967295, %s1348_s24   ;;  %s1348_s24 = sphi %s1447_s24, %s1747_s24   ;;  %s1344_s23 = sphi %s1445_s23, %s1749_s23   ;;  %s1340_s22 = sphi %s1443_s22, %s1751_s22   ;;  %s1336_s21 = sphi %s1441_s21, %s1750_s21  }
   0xc   : > { %1728 = sst [smem:[#allocation9_spill]] %s1344_s23  ;;  %s1125_s26 = sadd.s32 4294967294, %s1348_s24  }
   0xd   : > { %s1466_s27 = sadd.s32 1, %s1348_s24   ;;  %s65_s28 = sadd.s32 1, %s1344_s23 }
   0xe   : > { %1729 = sst [smem:[#allocation10_spill]] %s1466_s27  ;;  %s62_s29 = ssub.s32 %s1348_s24, %s1466_s27 }
   0xf   : > { %p72_p0 = scmp.ne.s32.totalorder %s1344_s23, %s1340_s22  ;;  %p63_p1 = scmp.eq.s32.totalorder %s62_s29, 0 }
  0x10   : > { %p73_p2 = scmp.eq.s32.totalorder %s1348_s24, 0  ;;  %p78_p3 = scmp.ne.s32.totalorder %s1340_s22, %s1336_s21 }
  0x11   : > { %p79_p4 = scmp.eq.s32.totalorder %s1462_s25, 0  ;;  %p396_p7 = scmp.eq.s32.totalorder %s1462_s25, 1 }
  0x12   : > { %s1478_s30 = scalar_select %p63_p1, %s1344_s23, %s65_s28  }
  0x13   : > { %p1480_p5 = por %p73_p2, %p72_p0  ;;  %p1484_p6 = por %p79_p4, %p78_p3 }
  0x14   : > { %1730 = sst [smem:[#allocation11_spill]] %s1478_s30  ;;  %p402_p8 = scmp.eq.s32.totalorder %s1125_s26, 1 }
  0x15   : > { %p1182_p10 = scmp.lt.s32.totalorder %s1348_s24, 2  ;;  %p1491_p11 = por %p396_p7, %p72_p0 }
  0x16   : > { %p1495_p12 = por %p402_p8, %p78_p3  ;;  %s473_s20 = sand.u32 1, %s1344_s23  }
  0x17   : > { %s1733_s18 = scalar_select %p1491_p11, 1, 0 }
  0x18   : > { %s1735_s19 = scalar_select %p1495_p12, 1, 0 }
  0x19   : > { %1734 = sst [smem:[#allocation12_spill]] %s1733_s18  ;;  %s1164_s28 = sshll.u32 %s1348_s24, 4 }
  0x1a   : > { %1736 = sst [smem:[#allocation13_spill]] %s1735_s19  ;;  %s1128_s29 = sshll.u32 %s473_s20, 4 }
  0x1b   : > { %s1737_s1 = sld [smem:[#allocation15_spill]]  ;;  %s477_s26 = scalar_lea.vmem [#allocation2], %s1128_s29 }
  0x1c   : > { %s485_s15 = sshll.u32 %s477_s26, 4  ;;  %p1506_p13 = pnand %p1182_p10, %p1480_p5  ;;  %s486_s15 = int_to_ptr.vmem [resolvable:$true] %s485_s15 }
  0x1d   : > { %p1131_p0 = scmp.ge.s32.totalorder %s1348_s24, 1  ;;  %p493_p1 = scmp.lt.s32.totalorder %s1348_s24, 3 }
  0x1e   : > { %s474_s23 = scalar_lea.sflag [#allocation3], %s473_s20  ;;  %p1256_p3 = pneg %p1506_p13 }
  0x21   : > { %s482_s21 = scalar_lea.hbm %s1737_s1, %s1164_s28  ;;  %s1259_s30 = scalar_lea.hbm %s1737_s1, 32 }
  0x22   : > { %s483_s16 = sshll.u32 %s482_s21, 4  ;;  %s484_s16 = int_to_ptr.hbm [resolvable:$true] %s483_s16 }
  0x23   : > { %s1252_s19 = sshra.s32 %s484_s16, 4  ;;  %s1253_s19 = int_to_ptr.hbm [resolvable:$true] %s1252_s19 }
  0x24   : > { %s1254_s18 = scalar_lea.hbm %s1253_s19, 16  ;;  %p1260_p5 = scmp.lt.s32.totalorder %s1253_s19, %s1737_s1 }
  0x25   : > { %p1255_p2 = scmp.ne.s32.totalorder %s1253_s19, %s1254_s18  ;;  %p1261_p8 = scmp.lt.s32.totalorder %s1259_s30, %s1254_s18 }
  0x27   : > { %p1257_p4 = pnand %p1256_p3, %p1255_p2  ;;  %p1262_p10 = por %p1261_p8, %p1260_p5 }
  0x29   : > { %p1258_p7 = pneg %p1257_p4 }
  0x2b   : > { %p1263_p9 = pnand %p1262_p10, %p1258_p7 }
  0x2d   : > { %1266 = shalt.err (!%p1263_p9)
}
  0x2e   : > { %s1350_s20 = smov 128   ;;  %s1351_s29 = smov 8  }
  0x2f   : > { %1177 = dma.hbm_to_vmem [thread:$0]  (!%p1506_p13), %s484_s16, 256, %s486_s15, %s474_s23, %s1350_s20, %s1350_s20, %s1351_s29  }
  0x30   : > { %p494_p2 = pnand %p1131_p0, %p493_p1 }
  0x31   : > { %s1527_s26 = sand.u32 (!%p494_p2), 1, %s1340_s22  }
  0x32   : > { %497 = sbr.rel (%p494_p2) target bundleno = 1553 (0x611), region = 84  ;;  %s1132_s18 = sshll.u32 (!%p494_p2), %s1527_s26, 4 }
  0x33   : > { %s500_s19 = scalar_lea.sflag (!%p494_p2), [#allocation3], %s1527_s26  ;;  %s503_s21 = scalar_lea.vmem (!%p494_p2), [#allocation2], %s1132_s18 }
  0x37   : > { %1327 = dma.done.wait (%p1484_p6), %s500_s19, 256  }
  0x38   : > { %1329 = vsyncadd (%p1484_p6), %s500_s19, 4294967040  ;;  %s1134_s14 = sshll.u32 %s1462_s25, 1  ;;  %s1739_s27 = sld [smem:[#allocation14_spill]]  ;;  %v1543_v1 = vld [vmem:[%s503_s21] sm:$0xff]  ;;  %vm575_vm0 = vcmask 261120   ;;  %v1549_v4 = vld [vmem:[%s503_s21 + $0x8] sm:$0xff] }
  0x39   : > { %p559_p9 = scmp.lt.s32.totalorder %s1134_s14, 3  ;;  %v1352_v8 = vmov 32.0   ;;  %v639_v30 = vld [vmem:[%s1702_s5] sm:$0xff]  ;;  %v1353_v33 = vmov 0   ;;  %vm645_vm8 = vcmask 130048   ;;  %vm730_vm13 = vcmask 1043456  }
  0x3a   : > { %1232 = vrcp.f32 %v1352_v8  ;;  %1222 = vset.pattern.permute.xlu2 %v1353_v33  ;;  %1223 = vset.pattern.permute.xlu0 %v1353_v33  ;;  %v709_v37 = vld [vmem:[%s1704_s7] sm:$0xff]  ;;  %vm726_vm14 = vcmask 64512   ;;  %s1740_s29 = sld [smem:[#allocation16_spill]]  ;;  %s557_s17 = scalar_lea.vmem [#allocation5], %s1132_s18 }
  0x3b   : > { %s1753_s14 = smov (!%p559_p9, %s1134_s14), 3  ;;  %642 = vperm.xlu2 %1222, %v639_v30   ;;  %v1224_v47 = vld [vmem:[%s1699_s2] ss:$0 sm:$0xff]  ;;  %s1037_s28 = sshll.u32 %s557_s17, 4  ;;  %s1038_s28 = int_to_ptr.vmem [resolvable:$true] %s1037_s28 }
  0x3c   : > { %s1135_s15 = sshll.u32 %s1753_s14, 3  ;;  %v1225_v52 = vld [vmem:[%s1700_s3] ss:$0 sm:$0xff]  ;;  %s1741_s14 = sld [smem:[#allocation17_spill]] }
  0x3d   : > { %v637_v57 = vld [vmem:[%s1701_s4] sm:$0xf]  ;;  %s1025_s20 = scalar_lea.sflag [#allocation4], %s1527_s26 }
  0x3e   : > { %s562_s30 = scalar_lea.vmem %s1739_s27, %s1135_s15  ;;  %s1169_s15 = sshll.u32 %s1462_s25, 4 }
  0x3f   : > { %v1541_v0 = vld [vmem:[%s562_s30] sm:$0xff]  ;;  %v1545_v2 = vld [vmem:[%s562_s30 + $0x8] sm:$0xff]  ;;  %s1742_s27 = sld [smem:[#allocation18_spill]] }
  0x40   : > { %v571_v3 = vmul.f32 %v1543_v1, %v1541_v0  ;;  %v572_v6 = vmul.f32 %v1549_v4, %v1545_v2  ;;  %v1233_v9 = vpop.eup %1232 }
  0x41   : > { %v583_v10 = vmul.f32 32.0, %v1233_v9  ;;  %vm587_vm1 = vweird.f32 %v1233_v9 }
  0x42   : > { %v576_v5 = vsel %vm575_vm0, %v571_v3, 0.0  ;;  %v579_v7 = vsel %vm575_vm0, %v572_v6, 0.0 }
  0x43   : > { %577 = vadd.xlane.f32.xlu0 %v576_v5  ;;  %v584_v11 = vsub.f32 1.0, %v583_v10  ;;  %713 = vperm.xlu2 %1222, %v709_v37  }
  0x45   : > { %v585_v12 = vmul.f32 %v1233_v9, %v584_v11  ;;  %s1036_s30 = scalar_lea.hbm %s1742_s27, %s1169_s15 }
  0x46   : > { %s1039_s25 = sshll.u32 %s1036_s30, 4  ;;  %s1040_s25 = int_to_ptr.hbm [resolvable:$true] %s1039_s25 }
  0x47   : > { %v586_v13 = vadd.f32 %v1233_v9, %v585_v12 }
  0x49   : > { %v1555_v14 = vsel %vm587_vm1, %v1233_v9, %v586_v13 }
  0x4b   : > { %580 = vadd.xlane.f32.xlu0 %v579_v7 }
  0x95   : > { %v643_v58 = vpop.permute.xlu2 %642 }
  0xb6   : > { %v578_v15 = vpop.xlane.xlu0 %577 }
  0xb7   : > { %v589_v16 = vmul.f32 %v1555_v14, %v578_v15 }
  0xb9   : > { %v591_v17 = vsub.f32 %v571_v3, %v589_v16 }
  0xbb   : > { %v593_v18 = vmul.f32 %v591_v17, %v591_v17 }
  0xbd   : > { %v595_v19 = vsel %vm575_vm0, %v593_v18, 0.0 }
  0xbe   : > { %596 = vadd.xlane.f32.xlu1 %v595_v19  ;;  %v581_v20 = vpop.xlane.xlu0 %580 }
  0xbf   : > { %v590_v21 = vmul.f32 %v1555_v14, %v581_v20 }
  0xc1   : > { %v592_v22 = vsub.f32 %v572_v6, %v590_v21 }
  0xc3   : > { %v594_v23 = vmul.f32 %v592_v22, %v592_v22 }
  0xc5   : > { %v598_v24 = vsel %vm575_vm0, %v594_v23, 0.0  ;;  %v710_v23 = vld [vmem:[%s1704_s7 + $0x8] sm:$0xff] }
  0xc6   : > { %599 = vadd.xlane.f32.xlu1 %v598_v24  ;;  %718 = vperm.xlu0 %1223, %v710_v23  }
 0x131   : > { %v597_v25 = vpop.xlane.xlu1 %596 }
 0x132   : > { %v601_v26 = vmul.f32 %v597_v25, %v1555_v14 }
 0x134   : > { %v603_v27 = vadd.f32 1e-05, %v601_v26 }
 0x136   : > { %1234 = vrsqrt.f32 %v603_v27  ;;  %vm611_vm3 = vweird.f32 %v603_v27 }
 0x139   : > { %v600_v28 = vpop.xlane.xlu1 %599 }
 0x13a   : > { %v602_v29 = vmul.f32 %v600_v28, %v1555_v14 }
 0x13c   : > { %v1235_v31 = vpop.eup %1234  ;;  %v604_v32 = vadd.f32 1e-05, %v602_v29 }
 0x13d   : > { %v606_v34 = vmul.f32 %v1235_v31, %v603_v27  ;;  %vm612_vm2 = vweird.f32 %v1235_v31 }
 0x13e   : > { %1236 = vrsqrt.f32 %v604_v32  ;;  %vm613_vm4 = vmor %vm611_vm3, %vm612_vm2  ;;  %vm621_vm6 = vweird.f32 %v604_v32 }
 0x13f   : > { %v607_v35 = vmul.f32 %v1235_v31, %v606_v34 }
 0x141   : > { %v608_v36 = vmul.f32 0.5, %v607_v35 }
 0x143   : > { %v609_v38 = vsub.f32 1.5, %v608_v36 }
 0x144   : > { %v1237_v39 = vpop.eup %1236 }
 0x145   : > { %v610_v40 = vmul.f32 %v1235_v31, %v609_v38  ;;  %v616_v41 = vmul.f32 %v1237_v39, %v604_v32  ;;  %vm622_vm5 = vweird.f32 %v1237_v39 }
 0x146   : > { %vm623_vm7 = vmor %vm621_vm6, %vm622_vm5 }
 0x147   : > { %v617_v42 = vmul.f32 %v1237_v39, %v616_v41  ;;  %v614_v44 = vsel %vm613_vm4, %v1235_v31, %v610_v40 }
 0x148   : > { %v625_v46 = vmul.f32 %v614_v44, %v591_v17 }
 0x149   : > { %v618_v43 = vmul.f32 0.5, %v617_v42 }
 0x14a   : > { %v630_v51 = vmul.f32 %v1224_v47, %v625_v46  ;;  %v714_v46 = vpop.permute.xlu2 %713 }
 0x14b   : > { %v619_v45 = vsub.f32 1.5, %v618_v43 }
 0x14c   : > { %v635_v54 = vadd.f32 %v1225_v52, %v630_v51  ;;  %v719_v51 = vpop.permute.xlu0 %718 }
 0x14d   : > { %v620_v48 = vmul.f32 %v1237_v39, %v619_v45  ;;  %v1165_v45 = vld [vmem:[%s1703_s6] sm:$0xff] }
 0x14f   : > { %v624_v49 = vsel %vm623_vm7, %v1237_v39, %v620_v48 }
 0x150   : > { %v626_v50 = vmul.f32 %v624_v49, %v592_v22 }
 0x152   : > { %v631_v53 = vmul.f32 %v1224_v47, %v626_v50 }
 0x154   : > { %v636_v55 = vadd.f32 %v1225_v52, %v631_v53 }
 0x156   : > { %v638_v56 = vpack.c.bf16 %v636_v55, %v635_v54 }
 0x158   : > { %656 = vmatpush.bf16.msra.mxu0 %v638_v56 }
 0x15b   : > { %1136 = vmatmul.msk.bf16.vlgmr.msra.gmra.mxu0 %vm645_vm8, %v637_v57 }
 0x1d8   : > { %v658_v59 = vpop.f32.mrf.mxu0 }
 0x1d9   : > { %v659_v60 = vadd.f32 %v658_v59, %v643_v58 }
 0x1db   : > { %v663_v61 = vmul.f32 0.70710677, %v659_v60  ;;  %v662_v40 = vmul.f32 0.5, %v659_v60 }
 0x1dd   : > { %v664_v62 = vmul.f32 %v663_v61, %v663_v61 }
 0x1df   : > { %v665_v63 = vmin.f32 %v664_v62, 16.0 }
 0x1e0   : > { %v660_v3 = vpop.f32.mrf.mxu0 }
 0x1e1   : > { %v666_v5 = vmul.f32 2.1237322e-06, %v665_v63  ;;  %v677_v6 = vmul.f32 3.8918573e-05, %v665_v63 }
 0x1e3   : > { %v667_v7 = vadd.f32 0.00028619796, %v666_v5  ;;  %v678_v8 = vadd.f32 0.001143296, %v677_v6 }
 0x1e5   : > { %v668_v9 = vmul.f32 %v667_v7, %v665_v63  ;;  %v679_v10 = vmul.f32 %v678_v8, %v665_v63  ;;  %v1166_v7 = vld [vmem:[%s1707_s10] sm:$0xff] }
 0x1e7   : > { %v680_v11 = vadd.f32 0.014752088, %v679_v10  ;;  %v669_v12 = vadd.f32 0.0036580483, %v668_v9 }
 0x1e9   : > { %v681_v13 = vmul.f32 %v680_v11, %v665_v63  ;;  %v670_v16 = vmul.f32 %v669_v12, %v665_v63 }
 0x1eb   : > { %v682_v15 = vadd.f32 0.112945676, %v681_v13  ;;  %v671_v19 = vadd.f32 0.05243302, %v670_v16 }
 0x1ed   : > { %v683_v17 = vmul.f32 %v682_v15, %v665_v63  ;;  %v672_v22 = vmul.f32 %v671_v19, %v665_v63 }
 0x1ef   : > { %v684_v18 = vadd.f32 0.4994258, %v683_v17  ;;  %v673_v24 = vadd.f32 0.18741608, %v672_v22 }
 0x1f1   : > { %v685_v20 = vmul.f32 %v684_v18, %v665_v63  ;;  %v674_v26 = vmul.f32 %v673_v24, %v665_v63 }
 0x1f3   : > { %v686_v21 = vadd.f32 1.0, %v685_v20  ;;  %v675_v30 = vadd.f32 1.1283791, %v674_v26  ;;  %v1226_v26 = vld [vmem:[%s1705_s8] ss:$0 sm:$0xff] }
 0x1f5   : > { %1238 = vrcp.f32 %v686_v21  ;;  %v698_v29 = vand.u32 2147483648, %v686_v21  ;;  %v696_v32 = vand.u32 2147483647, %v686_v21  ;;  %vm692_vm10 = vweird.f32 %v686_v21 }
 0x1f6   : > { %v676_v35 = vmul.f32 %v675_v30, %v663_v61 }
 0x1f7   : > { %v699_v34 = vor.u32 1.1754944e-38, %v698_v29  ;;  %vm697_vm12 = vcmp.eq.f32.partialorder %v696_v32, 8.507059e+37 }
 0x1fb   : > { %v1239_v25 = vpop.eup %1238 }
 0x1fc   : > { %v688_v27 = vmul.f32 %v1239_v25, %v686_v21  ;;  %vm693_vm9 = vweird.f32 %v1239_v25 }
 0x1fd   : > { %vm694_vm11 = vmor %vm692_vm10, %vm693_vm9 }
 0x1fe   : > { %v689_v28 = vsub.f32 1.0, %v688_v27 }
 0x200   : > { %v690_v31 = vmul.f32 %v1239_v25, %v689_v28 }
 0x202   : > { %v691_v33 = vadd.f32 %v1239_v25, %v690_v31  ;;  %v1227_v31 = vld [vmem:[%s1706_s9] ss:$0 sm:$0xff] }
 0x204   : > { %v695_v36 = vsel %vm694_vm11, %v1239_v25, %v691_v33 }
 0x205   : > { %v700_v37 = vsel %vm697_vm12, %v699_v34, %v695_v36  ;;  %v1228_v36 = vld [vmem:[%s1708_s11] ss:$0 sm:$0xff] }
 0x206   : > { %v701_v38 = vmul.f32 %v700_v37, %v676_v35 }
 0x208   : > { %v1137_v39 = vclamps-f32 %v701_v38, 1.0 }
 0x20a   : > { %v704_v41 = vadd.f32 1.0, %v1137_v39 }
 0x20c   : > { %v705_v42 = vmul.f32 %v704_v41, %v662_v40 }
 0x20e   : > { %v708_v43 = vpack.c.bf16 %v705_v42, %v705_v42 }
 0x210   : > { %v732_v44 = vsel %vm730_vm13, %v708_v43, 0 }
 0x211   : > { %741 = vmatpush.bf16.msra.mxu1 %v732_v44 }
 0x214   : > { %1142 = vmatmul.msk.bf16.vlgmr.msra.gmra.mxu1 %vm726_vm14, %v1165_v45 }
 0x291   : > { %v743_v47 = vpop.f32.mrf.mxu1 }
 0x292   : > { %v744_v48 = vadd.f32 %v743_v47, %v714_v46 }
 0x294   : > { %v1586_v49 = vadd.f32 %v744_v48, %v1541_v0 }
 0x296   : > { %v750_v50 = vmul.f32 %v1586_v49, %v1543_v1 }
 0x298   : > { %v754_v52 = vsel %vm575_vm0, %v750_v50, 0.0 }
 0x299   : > { %v745_v53 = vpop.f32.mrf.mxu1  ;;  %755 = vadd.xlane.f32.xlu1 %v754_v52 }
 0x29a   : > { %v746_v54 = vadd.f32 %v745_v53, %v719_v51 }
 0x29c   : > { %v1592_v55 = vadd.f32 %v746_v54, %v1545_v2 }
 0x29e   : > { %v751_v56 = vmul.f32 %v1592_v55, %v1549_v4  ;;  %v1167_v4 = vld [vmem:[%s1707_s10 + $0x8] sm:$0xff] }
 0x29f   : > { %838 = vmatpush.bf16.msra.mxu2 %v1167_v4 }
 0x2a0   : > { %v757_v57 = vsel %vm575_vm0, %v751_v56, 0.0 }
 0x2a1   : > { %758 = vadd.xlane.f32.xlu2 %v757_v57 }
 0x2a3   : > { %839 = vmatpush.bf16.msra.mxu2 %v1166_v7 }
 0x30c   : > { %v756_v0 = vpop.xlane.xlu1 %755 }
 0x30d   : > { %v760_v58 = vmul.f32 %v756_v0, %v1555_v14 }
 0x30f   : > { %v762_v59 = vsub.f32 %v750_v50, %v760_v58 }
 0x311   : > { %v764_v1 = vmul.f32 %v762_v59, %v762_v59 }
 0x313   : > { %v766_v60 = vsel %vm575_vm0, %v764_v1, 0.0 }
 0x314   : > { %767 = vadd.xlane.f32.xlu1 %v766_v60  ;;  %v759_v61 = vpop.xlane.xlu2 %758 }
 0x315   : > { %v761_v62 = vmul.f32 %v759_v61, %v1555_v14 }
 0x317   : > { %v763_v63 = vsub.f32 %v751_v56, %v761_v62 }
 0x319   : > { %v765_v2 = vmul.f32 %v763_v63, %v763_v63 }
 0x31b   : > { %v769_v3 = vsel %vm575_vm0, %v765_v2, 0.0 }
 0x31c   : > { %770 = vadd.xlane.f32.xlu1 %v769_v3 }
 0x387   : > { %v768_v5 = vpop.xlane.xlu1 %767 }
 0x388   : > { %v772_v6 = vmul.f32 %v768_v5, %v1555_v14 }
 0x38a   : > { %v774_v8 = vadd.f32 1e-05, %v772_v6 }
 0x38c   : > { %1240 = vrsqrt.f32 %v774_v8  ;;  %vm782_vm1 = vweird.f32 %v774_v8 }
 0x38f   : > { %v771_v9 = vpop.xlane.xlu1 %770 }
 0x390   : > { %v773_v10 = vmul.f32 %v771_v9, %v1555_v14 }
 0x392   : > { %v1241_v11 = vpop.eup %1240  ;;  %v775_v12 = vadd.f32 1e-05, %v773_v10 }
 0x393   : > { %v777_v13 = vmul.f32 %v1241_v11, %v774_v8  ;;  %vm783_vm15 = vweird.f32 %v1241_v11 }
 0x394   : > { %1242 = vrsqrt.f32 %v775_v12  ;;  %vm784_vm2 = vmor %vm782_vm1, %vm783_vm15  ;;  %vm792_vm4 = vweird.f32 %v775_v12 }
 0x395   : > { %v778_v15 = vmul.f32 %v1241_v11, %v777_v13 }
 0x397   : > { %v779_v16 = vmul.f32 0.5, %v778_v15 }
 0x399   : > { %v780_v17 = vsub.f32 1.5, %v779_v16 }
 0x39a   : > { %v1243_v18 = vpop.eup %1242 }
 0x39b   : > { %v781_v19 = vmul.f32 %v1241_v11, %v780_v17  ;;  %v787_v20 = vmul.f32 %v1243_v18, %v775_v12  ;;  %vm793_vm3 = vweird.f32 %v1243_v18  ;;  %v1168_v12 = vld [vmem:[%s1709_s12] sm:$0xff] }
 0x39c   : > { %vm794_vm5 = vmor %vm792_vm4, %vm793_vm3  ;;  %957 = vmatpush.bf16.msra.mxu3 %v1168_v12 }
 0x39d   : > { %v788_v21 = vmul.f32 %v1243_v18, %v787_v20  ;;  %v785_v22 = vsel %vm784_vm2, %v1241_v11, %v781_v19 }
 0x39e   : > { %v796_v25 = vmul.f32 %v785_v22, %v762_v59 }
 0x39f   : > { %v789_v23 = vmul.f32 0.5, %v788_v21 }
 0x3a0   : > { %v801_v30 = vmul.f32 %v1226_v26, %v796_v25 }
 0x3a1   : > { %v790_v24 = vsub.f32 1.5, %v789_v23 }
 0x3a2   : > { %v806_v33 = vadd.f32 %v1227_v31, %v801_v30 }
 0x3a3   : > { %v791_v27 = vmul.f32 %v1243_v18, %v790_v24 }
 0x3a5   : > { %v795_v28 = vsel %vm794_vm5, %v1243_v18, %v791_v27 }
 0x3a6   : > { %v797_v29 = vmul.f32 %v795_v28, %v763_v63 }
 0x3a8   : > { %v802_v32 = vmul.f32 %v1226_v26, %v797_v29 }
 0x3aa   : > { %v807_v34 = vadd.f32 %v1227_v31, %v802_v32 }
 0x3ac   : > { %v808_v35 = vpack.c.bf16 %v807_v34, %v806_v33 }
 0x3ae   : > { %1151 = vmatmul.msk.bf16.vlgmr.msra.gmra.mxu2 %vm575_vm0, %v808_v35 }
 0x431   : > { %v841_v37 = vpop.f32.mrf.mxu2 }
 0x432   : > { %v1619_v38 = vadd.f32 %v1228_v36, %v841_v37 }
 0x434   : > { %v1622_v39 = vmul.f32 0.70710677, %v1619_v38 }
 0x436   : > { %v850_v40 = vmul.f32 %v1622_v39, %v1622_v39 }
 0x438   : > { %v851_v41 = vmin.f32 %v850_v40, 16.0 }
 0x439   : > { %v843_v42 = vpop.f32.mrf.mxu2 }
 0x43a   : > { %v852_v43 = vmul.f32 2.1237322e-06, %v851_v41  ;;  %v863_v44 = vmul.f32 3.8918573e-05, %v851_v41  ;;  %v1626_v45 = vadd.f32 %v1228_v36, %v843_v42 }
 0x43c   : > { %v853_v46 = vadd.f32 0.00028619796, %v852_v43  ;;  %v864_v47 = vadd.f32 0.001143296, %v863_v44  ;;  %v1629_v48 = vmul.f32 0.70710677, %v1626_v45 }
 0x43e   : > { %v865_v50 = vmul.f32 %v864_v47, %v851_v41  ;;  %v890_v51 = vmul.f32 %v1629_v48, %v1629_v48  ;;  %v854_v52 = vmul.f32 %v853_v46, %v851_v41 }
 0x440   : > { %v866_v53 = vadd.f32 0.014752088, %v865_v50  ;;  %v891_v54 = vmin.f32 %v890_v51, 16.0  ;;  %v855_v58 = vadd.f32 0.0036580483, %v854_v52 }
 0x442   : > { %v867_v56 = vmul.f32 %v866_v53, %v851_v41  ;;  %v892_v57 = vmul.f32 2.1237322e-06, %v891_v54  ;;  %v903_v0 = vmul.f32 3.8918573e-05, %v891_v54  ;;  %v856_v2 = vmul.f32 %v855_v58, %v851_v41 }
 0x443   : > { %v846_v58 = vmul.f32 0.5, %v1619_v38 }
 0x444   : > { %v868_v59 = vadd.f32 0.112945676, %v867_v56  ;;  %v893_v1 = vadd.f32 0.00028619796, %v892_v57  ;;  %v904_v60 = vadd.f32 0.001143296, %v903_v0 }
 0x445   : > { %v857_v8 = vadd.f32 0.05243302, %v856_v2 }
 0x446   : > { %v869_v61 = vmul.f32 %v868_v59, %v851_v41  ;;  %v894_v62 = vmul.f32 %v893_v1, %v891_v54  ;;  %v905_v63 = vmul.f32 %v904_v60, %v891_v54  ;;  %v847_v59 = vmul.f32 0.5, %v1626_v45 }
 0x447   : > { %v858_v15 = vmul.f32 %v857_v8, %v851_v41 }
 0x448   : > { %v870_v3 = vadd.f32 0.4994258, %v869_v61  ;;  %v895_v4 = vadd.f32 0.0036580483, %v894_v62  ;;  %v906_v5 = vadd.f32 0.014752088, %v905_v63 }
 0x449   : > { %v859_v20 = vadd.f32 0.18741608, %v858_v15 }
 0x44a   : > { %v871_v6 = vmul.f32 %v870_v3, %v851_v41  ;;  %v907_v7 = vmul.f32 %v906_v5, %v891_v54  ;;  %v896_v10 = vmul.f32 %v895_v4, %v891_v54 }
 0x44b   : > { %v860_v25 = vmul.f32 %v859_v20, %v851_v41 }
 0x44c   : > { %v872_v9 = vadd.f32 1.0, %v871_v6  ;;  %v908_v11 = vadd.f32 0.112945676, %v907_v7  ;;  %v897_v16 = vadd.f32 0.05243302, %v896_v10 }
 0x44d   : > { %v861_v31 = vadd.f32 1.1283791, %v860_v25 }
 0x44e   : > { %1244 = vrcp.f32 %v872_v9  ;;  %v909_v13 = vmul.f32 %v908_v11, %v891_v54  ;;  %v898_v22 = vmul.f32 %v897_v16, %v891_v54  ;;  %v884_v27 = vand.u32 2147483648, %v872_v9 }
 0x44f   : > { %v882_v29 = vand.u32 2147483647, %v872_v9  ;;  %vm878_vm7 = vweird.f32 %v872_v9  ;;  %v862_v40 = vmul.f32 %v861_v31, %v1622_v39 }
 0x450   : > { %v910_v17 = vadd.f32 0.4994258, %v909_v13  ;;  %v899_v28 = vadd.f32 0.18741608, %v898_v22  ;;  %v885_v34 = vor.u32 1.1754944e-38, %v884_v27 }
 0x451   : > { %vm883_vm10 = vcmp.eq.f32.partialorder %v882_v29, 8.507059e+37 }
 0x452   : > { %v911_v18 = vmul.f32 %v910_v17, %v891_v54  ;;  %v900_v35 = vmul.f32 %v899_v28, %v891_v54 }
 0x454   : > { %v1245_v19 = vpop.eup %1244  ;;  %v912_v23 = vadd.f32 1.0, %v911_v18  ;;  %v901_v41 = vadd.f32 1.1283791, %v900_v35 }
 0x455   : > { %v874_v21 = vmul.f32 %v1245_v19, %v872_v9  ;;  %vm879_vm6 = vweird.f32 %v1245_v19 }
 0x456   : > { %1246 = vrcp.f32 %v912_v23  ;;  %vm880_vm9 = vmor %vm878_vm7, %vm879_vm6  ;;  %v924_v43 = vand.u32 2147483648, %v912_v23  ;;  %v922_v47 = vand.u32 2147483647, %v912_v23  ;;  %vm918_vm12 = vweird.f32 %v912_v23 }
 0x457   : > { %v875_v24 = vsub.f32 1.0, %v874_v21  ;;  %v902_v53 = vmul.f32 %v901_v41, %v1629_v48  ;;  %v1229_v48 = vld [vmem:[%s1710_s13] ss:$0 sm:$0xff] }
 0x458   : > { %v925_v51 = vor.u32 1.1754944e-38, %v924_v43  ;;  %vm923_vm14 = vcmp.eq.f32.partialorder %v922_v47, 8.507059e+37 }
 0x459   : > { %v876_v26 = vmul.f32 %v1245_v19, %v875_v24 }
 0x45b   : > { %v877_v30 = vadd.f32 %v1245_v19, %v876_v26 }
 0x45c   : > { %v1247_v32 = vpop.eup %1246 }
 0x45d   : > { %v881_v33 = vsel %vm880_vm9, %v1245_v19, %v877_v30  ;;  %v914_v36 = vmul.f32 %v1247_v32, %v912_v23  ;;  %vm919_vm11 = vweird.f32 %v1247_v32  ;;  %v1230_v30 = vld [vmem:[%s1740_s29] ss:$0 sm:$0xff]  ;;  %s1296_s29 = sshra.s32 %s1040_s25, 4  ;;  %s1297_s29 = int_to_ptr.hbm [resolvable:$true] %s1296_s29 }
 0x45e   : > { %v886_v37 = vsel %vm883_vm10, %v885_v34, %v881_v33  ;;  %vm920_vm13 = vmor %vm918_vm12, %vm919_vm11  ;;  %s1298_s19 = scalar_lea.hbm %s1297_s29, 16  ;;  %p1303_p1 = scmp.lt.s32.totalorder %s1297_s29, %s1742_s27 }
 0x45f   : > { %v915_v42 = vsub.f32 1.0, %v914_v36  ;;  %v887_v44 = vmul.f32 %v886_v37, %v862_v40  ;;  %p1299_p6 = scmp.ne.s32.totalorder %s1297_s29, %s1298_s19 }
 0x461   : > { %v916_v46 = vmul.f32 %v1247_v32, %v915_v42  ;;  %v1152_v52 = vclamps-f32 %v887_v44, 1.0  ;;  %p1300_p13 = pnand %p1299_p6, %p1491_p11 }
 0x463   : > { %v917_v50 = vadd.f32 %v1247_v32, %v916_v46  ;;  %v930_v0 = vadd.f32 1.0, %v1152_v52  ;;  %p1301_p0 = pneg %p1300_p13 }
 0x465   : > { %v921_v54 = vsel %vm920_vm13, %v1247_v32, %v917_v50  ;;  %v932_v60 = vmul.f32 %v930_v0, %v846_v58  ;;  %v1231_v32 = vld [vmem:[%s1741_s14] ss:$0 sm:$0xff]  ;;  %s1302_s14 = scalar_lea.hbm %s1742_s27, 32 }
 0x466   : > { %v926_v56 = vsel %vm923_vm14, %v925_v51, %v921_v54  ;;  %p1304_p3 = scmp.lt.s32.totalorder %s1302_s14, %s1298_s19 }
 0x467   : > { %v927_v57 = vmul.f32 %v926_v56, %v902_v53 }
 0x468   : > { %p1305_p4 = por %p1304_p3, %p1303_p1 }
 0x469   : > { %v1153_v39 = vclamps-f32 %v927_v57, 1.0 }
 0x46a   : > { %p1306_p7 = pnand %p1305_p4, %p1301_p0 }
 0x46b   : > { %v931_v1 = vadd.f32 1.0, %v1153_v39 }
 0x46d   : > { %v933_v61 = vmul.f32 %v931_v1, %v847_v59 }
 0x46f   : > { %v934_v62 = vpack.c.bf16 %v933_v61, %v932_v60 }
 0x471   : > { %1158 = vmatmul.msk.bf16.vlgmr.msra.gmra.mxu3 %vm645_vm8, %v934_v62 }
 0x4f4   : > { %v959_v63 = vpop.f32.mrf.mxu3 }
 0x4f5   : > { %v960_v2 = vadd.f32 %v1229_v48, %v959_v63 }
 0x4f7   : > { %v964_v3 = vadd.f32 %v960_v2, %v1586_v49 }
 0x4f9   : > { %v968_v4 = vsel %vm575_vm0, %v964_v3, 0.0 }
 0x4fa   : > { %969 = vadd.xlane.f32.xlu1 %v968_v4 }
 0x4fc   : > { %v961_v38 = vpop.f32.mrf.mxu3 }
 0x4fd   : > { %v962_v5 = vadd.f32 %v1229_v48, %v961_v38 }
 0x4ff   : > { %v965_v45 = vadd.f32 %v962_v5, %v1592_v55 }
 0x501   : > { %v971_v6 = vsel %vm575_vm0, %v965_v45, 0.0 }
 0x502   : > { %972 = vadd.xlane.f32.xlu1 %v971_v6 }
 0x56d   : > { %v970_v7 = vpop.xlane.xlu1 %969 }
 0x56e   : > { %v974_v8 = vmul.f32 %v970_v7, %v1555_v14 }
 0x570   : > { %v976_v9 = vsub.f32 %v964_v3, %v974_v8 }
 0x572   : > { %v978_v10 = vmul.f32 %v976_v9, %v976_v9 }
 0x574   : > { %v980_v11 = vsel %vm575_vm0, %v978_v10, 0.0 }
 0x575   : > { %981 = vadd.xlane.f32.xlu0 %v980_v11  ;;  %v973_v12 = vpop.xlane.xlu1 %972 }
 0x576   : > { %v975_v49 = vmul.f32 %v973_v12, %v1555_v14 }
 0x578   : > { %v977_v13 = vsub.f32 %v965_v45, %v975_v49 }
 0x57a   : > { %v979_v15 = vmul.f32 %v977_v13, %v977_v13 }
 0x57c   : > { %v983_v16 = vsel %vm575_vm0, %v979_v15, 0.0 }
 0x57d   : > { %984 = vadd.xlane.f32.xlu1 %v983_v16 }
 0x5e8   : > { %v982_v55 = vpop.xlane.xlu0 %981 }
 0x5e9   : > { %v986_v17 = vmul.f32 %v982_v55, %v1555_v14 }
 0x5eb   : > { %v988_v18 = vadd.f32 1e-05, %v986_v17 }
 0x5ed   : > { %1248 = vrsqrt.f32 %v988_v18  ;;  %vm996_vm15 = vweird.f32 %v988_v18 }
 0x5f0   : > { %v985_v19 = vpop.xlane.xlu1 %984 }
 0x5f1   : > { %v987_v20 = vmul.f32 %v985_v19, %v1555_v14 }
 0x5f3   : > { %v1249_v21 = vpop.eup %1248  ;;  %v989_v22 = vadd.f32 1e-05, %v987_v20 }
 0x5f4   : > { %v991_v23 = vmul.f32 %v1249_v21, %v988_v18  ;;  %vm997_vm8 = vweird.f32 %v1249_v21 }
 0x5f5   : > { %1250 = vrsqrt.f32 %v989_v22  ;;  %vm998_vm1 = vmor %vm996_vm15, %vm997_vm8  ;;  %vm1006_vm3 = vweird.f32 %v989_v22 }
 0x5f6   : > { %v992_v24 = vmul.f32 %v1249_v21, %v991_v23 }
 0x5f8   : > { %v993_v25 = vmul.f32 0.5, %v992_v24 }
 0x5fa   : > { %v994_v26 = vsub.f32 1.5, %v993_v25 }
 0x5fb   : > { %v1251_v27 = vpop.eup %1250 }
 0x5fc   : > { %v995_v28 = vmul.f32 %v1249_v21, %v994_v26  ;;  %v1001_v29 = vmul.f32 %v1251_v27, %v989_v22  ;;  %vm1007_vm2 = vweird.f32 %v1251_v27 }
 0x5fd   : > { %vm1008_vm4 = vmor %vm1006_vm3, %vm1007_vm2 }
 0x5fe   : > { %v999_v14 = vsel %vm998_vm1, %v1249_v21, %v995_v28  ;;  %v1002_v31 = vmul.f32 %v1251_v27, %v1001_v29 }
 0x5ff   : > { %v1010_v33 = vmul.f32 %v999_v14, %v976_v9 }
 0x600   : > { %v1003_v34 = vmul.f32 0.5, %v1002_v31 }
 0x601   : > { %v1015_v35 = vmul.f32 %v1230_v30, %v1010_v33 }
 0x602   : > { %v1004_v36 = vsub.f32 1.5, %v1003_v34 }
 0x603   : > { %v1020_v37 = vadd.f32 %v1231_v32, %v1015_v35 }
 0x604   : > { %v1005_v40 = vmul.f32 %v1251_v27, %v1004_v36 }
 0x605   : > { %1022 = vst.msk [vmem:[%s557_s17] sm:$0xff] %vm575_vm0, %v1020_v37 }
 0x606   : > { %v1009_v42 = vsel %vm1008_vm4, %v1251_v27, %v1005_v40 }
 0x607   : > { %v1011_v41 = vmul.f32 %v1009_v42, %v977_v13 }
 0x609   : > { %v1016_v43 = vmul.f32 %v1230_v30, %v1011_v41 }
 0x60b   : > { %v1021_v44 = vadd.f32 %v1231_v32, %v1016_v43 }
 0x60d   : > { %1023 = vst.msk [vmem:[%s557_s17 + $0x8] sm:$0xff] %vm575_vm0, %v1021_v44 }
 0x60e   : > { %1309 = shalt.err (!%p1306_p7)
}
 0x60f   : > { %s1354_s26 = smov 128   ;;  %s1355_s23 = smov 8  }
 0x610   : > { %1172 = dma.vmem_to_hbm [thread:$0]  (%p1491_p11), %s1038_s28, 256, %s1040_s25, %s1025_s20, %s1354_s26, %s1354_s26, %s1355_s23  }
 0x611 PF: > { %s1744_s30 = sld [smem:[#allocation8_spill]]  ;;  %p1746_p5 = scmp.ge.s32.totalorder %s1348_s24, 2 }
 0x613   : > { %p1179_p8 = pnand %p1746_p5, %p1495_p12 }
 0x615   : > { %p1180_p10 = pneg %p1179_p8 }
 0x617   : > { %s1054_s1 = sand.u32 1, %s1744_s30  }
 0x618   : > { %s1055_s18 = scalar_lea.sflag [#allocation4], %s1054_s1 }
 0x619   : > { %1331 = dma.done.wait (%p1180_p10), %s1055_s18, 256  }
 0x61a   : > { %1333 = vsyncadd (%p1180_p10), %s1055_s18, 4294967040  ;;  %s1747_s24 = sld [smem:[#allocation10_spill]]  ;;  %s1750_s21 = smov %s1340_s22 }
 0x61b   : > { %s1748_s29 = sld [smem:[#allocation9_spill]] }
 0x61c   : > { %s1749_s23 = sld [smem:[#allocation11_spill]] }
 0x620   : > { %p29_p2 = scmp.ge.s32.totalorder %s1747_s24, 4  }
 0x621   : > { %s1751_s22 = smov %s1748_s29 }
 0x622   :  { %31 = sbr.rel (!%p29_p2) target bundleno = 11 (0xb), region = 132 }
 0x627   :  { %1061 = vsyncpa [#allocation3], 1 }
 0x628   :  { %1063 = vsyncpa [#allocation3 + $0x1], 1 }
 0x629   :  { %1064 = vsyncpa [#allocation4], 1 }
 0x62a   :  { %1066 = vsyncpa [#allocation4 + $0x1], 1 }

</bundles_post_ra>
